<compile_context>
chip_gen: v7x
topology: tpu7x:2x2x1
jax: 0.10.0
libtpu: 0.0.40
codegen_flags: <defaults>
</compile_context>

<pallas_src>
import functools

import jax
import jax.numpy as jnp
from jax.experimental import pallas as pl
from jax.experimental.pallas import tpu as pltpu


def _round_up(x, m):
    return ((x + m - 1) // m) * m


def coupling_kernel(z2_ref, z1_ref, ldj_ref,
                    w1_ref, b1_ref, w2_ref, b2_ref,
                    sfac_ref, inv_sfac_ref,
                    z2_out_ref, ldj_out_ref,
                    *, reverse: bool):
    half = z1_ref.shape[1]

    z1 = z1_ref[...]          # [TB, half] f32  (conditioning half, passed through outside)
    z2 = z2_ref[...]          # [TB, half] f32  (half to transform)

    # Fused first layers of scale_net || translate_net: one MXU pass (bf16 in, f32 acc).
    h = jnp.dot(z1.astype(jnp.bfloat16), w1_ref[...],
                preferred_element_type=jnp.float32) + b1_ref[...]
    h = jnp.maximum(h, 0.0)

    # Fused block-diagonal second layers: [TB, 2*hid] @ [2*hid, 2*half] -> [s | t].
    st = jnp.dot(h.astype(jnp.bfloat16), w2_ref[...],
                 preferred_element_type=jnp.float32) + b2_ref[...]
    s = st[:, :half]
    t = st[:, half:]

    # Soft clamp of the scale; exp(sf) and 1/exp(sf) are precomputed in the wrapper.
    s = jnp.tanh(s * inv_sfac_ref[...]) * sfac_ref[...]

    if reverse:
        # TODO(synk): original reverse path sums ldj over dims [1,2,3] (NCHW conv maps);
        # for the flat [B, D] layout used here we sum over the feature axis.
        z2_new = z2 * jnp.exp(-s) - t
        ldj_new = ldj_ref[...] - jnp.sum(s, axis=1, keepdims=True)
    else:
        z2_new = (z2 + t) * jnp.exp(s)
        ldj_new = ldj_ref[...] + jnp.sum(s, axis=1, keepdims=True)

    z2_out_ref[...] = z2_new.astype(z2_out_ref.dtype)
    ldj_out_ref[...] = ldj_new


def coupling_layer_forward(z, ldj, params, *, invert=False, reverse=False, tile_b=512):
    """z: [B, D] f32, ldj: [B] f32, params: dict (see init_params). Returns (z_out, ldj_out)."""
    B, D = z.shape
    half = D // 2
    hid = params["w1s"].shape[1]

    # Split per the module's masking convention (in XLA, keeps kernel I/O contiguous).
    if invert:
        z1, z2 = z[:, :half], z[:, half:]
    else:
        z2, z1 = z[:, :half], z[:, half:]

    # Fused weights: first layers side by side, second layers block-diagonal (bf16 for MXU).
    w1 = jnp.concatenate([params["w1s"], params["w1t"]], axis=1).astype(jnp.bfloat16)   # [half, 2*hid]
    b1 = jnp.concatenate([params["b1s"], params["b1t"]], axis=0).reshape(1, 2 * hid)
    zblk = jnp.zeros((hid, half), jnp.float32)
    w2 = jnp.concatenate(
        [jnp.concatenate([params["w2s"], zblk], axis=1),
         jnp.concatenate([zblk, params["w2t"]], axis=1)], axis=0).astype(jnp.bfloat16)  # [2*hid, 2*half]
    b2 = jnp.concatenate([params["b2s"], params["b2t"]], axis=0).reshape(1, 2 * half)

    # Hoist exp(scaling_factor) and its reciprocal out of the kernel.
    s_fac = jnp.exp(params["scaling_factor"]).reshape(1, half).astype(jnp.float32)
    inv_s_fac = 1.0 / s_fac

    # Pad the batch to a multiple of the batch tile (>= 8 sublanes).
    tile_b = _round_up(max(8, min(tile_b, B)), 8)
    b_pad = _round_up(B, tile_b)
    ldj2d = ldj.reshape(B, 1).astype(jnp.float32)
    if b_pad != B:
        pad = ((0, b_pad - B), (0, 0))
        z2_in, z1_in, ldj_in = jnp.pad(z2, pad), jnp.pad(z1, pad), jnp.pad(ldj2d, pad)
    else:
        z2_in, z1_in, ldj_in = z2, z1, ldj2d

    grid = (b_pad // tile_b,)

    def batch_spec(cols):
        return pl.BlockSpec((tile_b, cols), lambda i: (i, 0))

    def resident_spec(arr):   # whole array, same block every grid step -> fetched once
        return pl.BlockSpec(arr.shape, lambda i: (0, 0))

    z2_new, ldj_out = pl.pallas_call(
        functools.partial(coupling_kernel, reverse=reverse),
        out_shape=(jax.ShapeDtypeStruct((b_pad, half), z.dtype),
                   jax.ShapeDtypeStruct((b_pad, 1), jnp.float32)),
        grid=grid,
        in_specs=[batch_spec(half), batch_spec(half), batch_spec(1),
                  resident_spec(w1), resident_spec(b1),
                  resident_spec(w2), resident_spec(b2),
                  resident_spec(s_fac), resident_spec(inv_s_fac)],
        out_specs=(batch_spec(half), batch_spec(1)),
        compiler_params=pltpu.CompilerParams(dimension_semantics=("parallel",)),
    )(z2_in, z1_in, ldj_in, w1, b1, w2, b2, s_fac, inv_s_fac)

    z2_new = z2_new[:B]
    ldj_out = ldj_out[:B, 0]

    # Re-attach the untouched conditioning half in XLA (kernel only writes the
    # transformed half -> halves kernel output traffic, no masked partial stores).
    if invert:
        z_out = jnp.concatenate([z1, z2_new], axis=1)
    else:
        z_out = jnp.concatenate([z2_new, z1], axis=1)
    return z_out, ldj_out


def init_params(key, input_dim, hidden=128):
    """Deterministic init mimicking nn.Linear defaults (uniform +-1/sqrt(fan_in)).
    Weights are stored transposed ([in, out]) for direct x @ W matmuls."""
    half = input_dim // 2
    ks = jax.random.split(key, 9)

    def lin(kw, kb, fan_in, fan_out):
        bound = 1.0 / jnp.sqrt(fan_in)
        w = jax.random.uniform(kw, (fan_in, fan_out), jnp.float32, -bound, bound)
        b = jax.random.uniform(kb, (fan_out,), jnp.float32, -bound, bound)
        return w, b

    w1s, b1s = lin(ks[0], ks[1], half, hidden)
    w2s, b2s = lin(ks[2], ks[3], hidden, half)
    w1t, b1t = lin(ks[4], ks[5], half, hidden)
    w2t, b2t = lin(ks[6], ks[7], hidden, half)
    # The module inits scaling_factor to zeros; use a small nonzero value here so the
    # soft-clamp path is genuinely exercised by the correctness check.
    sf = 0.1 * jax.random.normal(ks[8], (half,), jnp.float32)
    return {
        "w1s": w1s, "b1s": b1s, "w2s": w2s, "b2s": b2s,
        "w1t": w1t, "b1t": b1t, "w2t": w2t, "b2t": b2t,
        "scaling_factor": sf,
    }


def reference_forward(z, ldj, params, *, invert=False, reverse=False):
    """Plain-JAX reference (same bf16 matmul operands / f32 accumulation as the kernel)."""
    D = z.shape[1]
    half = D // 2
    if invert:
        z1, z2 = z[:, :half], z[:, half:]
    else:
        z2, z1 = z[:, :half], z[:, half:]

    def mlp(w1, b1, w2, b2):
        h = jnp.dot(z1.astype(jnp.bfloat16), w1.astype(jnp.bfloat16),
                    preferred_element_type=jnp.float32) + b1
        h = jnp.maximum(h, 0.0)
        return jnp.dot(h.astype(jnp.bfloat16), w2.astype(jnp.bfloat16),
                       preferred_element_type=jnp.float32) + b2

    s = mlp(params["w1s"], params["b1s"], params["w2s"], params["b2s"])
    t = mlp(params["w1t"], params["b1t"], params["w2t"], params["b2t"])
    s_fac = jnp.exp(params["scaling_factor"])[None, :]
    s = jnp.tanh(s / s_fac) * s_fac
    if reverse:
        z2 = z2 * jnp.exp(-s) - t
        ldj = ldj - s.sum(axis=1)
    else:
        z2 = (z2 + t) * jnp.exp(s)
        ldj = ldj + s.sum(axis=1)
    out = jnp.concatenate([z1, z2], axis=1) if invert else jnp.concatenate([z2, z1], axis=1)
    return out, ldj


if __name__ == "__main__":
    B, D = 200, 64            # batch deliberately not a multiple of the batch tile
    key = jax.random.PRNGKey(0)
    kz, kl, kp = jax.random.split(key, 3)

    z = jax.random.normal(kz, (B, D), jnp.float32)
    ldj = jax.random.normal(kl, (B,), jnp.float32)
    params = init_params(kp, D)

    # forward (reverse=False) — small tile to exercise a multi-step parallel grid + padding
    z_out, ldj_out = coupling_layer_forward(z, ldj, params, tile_b=64)
    jax.block_until_ready((z_out, ldj_out))
    z_ref, ldj_ref = reference_forward(z, ldj, params)
    assert jnp.allclose(z_out, z_ref, atol=5e-4, rtol=5e-4)
    assert jnp.allclose(ldj_out, ldj_ref, atol=5e-4, rtol=5e-4)

    # inverse direction (reverse=True)
    z_rev, ldj_rev = coupling_layer_forward(z, ldj, params, tile_b=64, reverse=True)
    jax.block_until_ready((z_rev, ldj_rev))
    z_rref, ldj_rref = reference_forward(z, ldj, params, reverse=True)
    assert jnp.allclose(z_rev, z_rref, atol=5e-4, rtol=5e-4)
    assert jnp.allclose(ldj_rev, ldj_rref, atol=5e-4, rtol=5e-4)

    print("KERNEL_OK")
</pallas_src>

<mosaic_0001>
module attributes {stable_mosaic.version = 11 : i64} {
  func.func @coupling_kernel(%arg0: i32, %arg1: memref<64x32xf32, #tpu.memory_space<vmem>>, %arg2: memref<64x32xf32, #tpu.memory_space<vmem>>, %arg3: memref<64x1xf32, #tpu.memory_space<vmem>>, %arg4: memref<32x256xbf16, #tpu.memory_space<vmem>>, %arg5: memref<1x256xf32, #tpu.memory_space<vmem>>, %arg6: memref<256x64xbf16, #tpu.memory_space<vmem>>, %arg7: memref<1x64xf32, #tpu.memory_space<vmem>>, %arg8: memref<1x32xf32, #tpu.memory_space<vmem>>, %arg9: memref<1x32xf32, #tpu.memory_space<vmem>>, %arg10: memref<64x32xf32, #tpu.memory_space<vmem>>, %arg11: memref<64x1xf32, #tpu.memory_space<vmem>>) attributes {dimension_semantics = [#tpu.dimension_semantics<parallel>], iteration_bounds = array<i64: 4>, scalar_prefetch = 0 : i64, scratch_operands = 0 : i64, tpu.core_type = #tpu.core_type<tc>, window_params = [{transform_indices = @transform_0, window_bounds = array<i64: 64, 32>}, {transform_indices = @transform_1, window_bounds = array<i64: 64, 32>}, {transform_indices = @transform_2, window_bounds = array<i64: 64, 1>}, {pipeline_mode = #tpu.pipeline_mode<synchronous>, transform_indices = @transform_3, window_bounds = array<i64: 32, 256>}, {pipeline_mode = #tpu.pipeline_mode<synchronous>, transform_indices = @transform_4, window_bounds = array<i64: 1, 256>}, {pipeline_mode = #tpu.pipeline_mode<synchronous>, transform_indices = @transform_5, window_bounds = array<i64: 256, 64>}, {pipeline_mode = #tpu.pipeline_mode<synchronous>, transform_indices = @transform_6, window_bounds = array<i64: 1, 64>}, {pipeline_mode = #tpu.pipeline_mode<synchronous>, transform_indices = @transform_7, window_bounds = array<i64: 1, 32>}, {pipeline_mode = #tpu.pipeline_mode<synchronous>, transform_indices = @transform_8, window_bounds = array<i64: 1, 32>}, {transform_indices = @transform_9, window_bounds = array<i64: 64, 32>}, {transform_indices = @transform_10, window_bounds = array<i64: 64, 1>}]} {
    %c0 = arith.constant 0 : index
    %c0_0 = arith.constant 0 : index
    %0 = vector.load %arg2[%c0, %c0_0] : memref<64x32xf32, #tpu.memory_space<vmem>>, vector<64x32xf32>
    %c0_1 = arith.constant 0 : index
    %c0_2 = arith.constant 0 : index
    %1 = vector.load %arg1[%c0_1, %c0_2] : memref<64x32xf32, #tpu.memory_space<vmem>>, vector<64x32xf32>
    %2 = arith.truncf %0 : vector<64x32xf32> to vector<64x32xbf16>
    %c0_3 = arith.constant 0 : index
    %c0_4 = arith.constant 0 : index
    %3 = vector.load %arg4[%c0_3, %c0_4] : memref<32x256xbf16, #tpu.memory_space<vmem>>, vector<32x256xbf16>
    %cst = arith.constant dense<0.000000e+00> : vector<64x256xf32>
    %4 = tpu.matmul %2, %3, %cst {dimension_numbers = #tpu.dot_dimension_numbers<[1], [0], [0], [1], [0, 0, 1, 1], [], []>} : vector<64x32xbf16>, vector<32x256xbf16>, vector<64x256xf32> -> vector<64x256xf32>
    %c0_5 = arith.constant 0 : index
    %c0_6 = arith.constant 0 : index
    %5 = vector.load %arg5[%c0_5, %c0_6] : memref<1x256xf32, #tpu.memory_space<vmem>>, vector<1x256xf32>
    %6 = vector.broadcast %5 : vector<1x256xf32> to vector<64x256xf32>
    %7 = arith.addf %4, %6 : vector<64x256xf32>
    %cst_7 = arith.constant 0.000000e+00 : f32
    %8 = vector.broadcast %cst_7 : f32 to vector<64x256xf32>
    %9 = arith.maximumf %7, %8 : vector<64x256xf32>
    %10 = arith.truncf %9 : vector<64x256xf32> to vector<64x256xbf16>
    %c0_8 = arith.constant 0 : index
    %c0_9 = arith.constant 0 : index
    %11 = vector.load %arg6[%c0_8, %c0_9] : memref<256x64xbf16, #tpu.memory_space<vmem>>, vector<256x64xbf16>
    %cst_10 = arith.constant dense<0.000000e+00> : vector<64x64xf32>
    %12 = tpu.matmul %10, %11, %cst_10 {dimension_numbers = #tpu.dot_dimension_numbers<[1], [0], [0], [1], [0, 0, 1, 1], [], []>} : vector<64x256xbf16>, vector<256x64xbf16>, vector<64x64xf32> -> vector<64x64xf32>
    %c0_11 = arith.constant 0 : index
    %c0_12 = arith.constant 0 : index
    %13 = vector.load %arg7[%c0_11, %c0_12] : memref<1x64xf32, #tpu.memory_space<vmem>>, vector<1x64xf32>
    %14 = vector.broadcast %13 : vector<1x64xf32> to vector<64x64xf32>
    %15 = arith.addf %12, %14 : vector<64x64xf32>
    %16 = vector.extract_strided_slice %15 {offsets = [0, 0], sizes = [64, 32], strides = [1, 1]} : vector<64x64xf32> to vector<64x32xf32>
    %17 = vector.extract_strided_slice %15 {offsets = [0, 32], sizes = [64, 32], strides = [1, 1]} : vector<64x64xf32> to vector<64x32xf32>
    %c0_13 = arith.constant 0 : index
    %c0_14 = arith.constant 0 : index
    %18 = vector.load %arg9[%c0_13, %c0_14] : memref<1x32xf32, #tpu.memory_space<vmem>>, vector<1x32xf32>
    %19 = vector.broadcast %18 : vector<1x32xf32> to vector<64x32xf32>
    %20 = arith.mulf %16, %19 : vector<64x32xf32>
    %21 = math.tanh %20 : vector<64x32xf32>
    %c0_15 = arith.constant 0 : index
    %c0_16 = arith.constant 0 : index
    %22 = vector.load %arg8[%c0_15, %c0_16] : memref<1x32xf32, #tpu.memory_space<vmem>>, vector<1x32xf32>
    %23 = vector.broadcast %22 : vector<1x32xf32> to vector<64x32xf32>
    %24 = arith.mulf %21, %23 : vector<64x32xf32>
    %25 = arith.addf %1, %17 : vector<64x32xf32>
    %26 = math.exp %24 : vector<64x32xf32>
    %27 = arith.mulf %25, %26 : vector<64x32xf32>
    %c0_17 = arith.constant 0 : index
    %c0_18 = arith.constant 0 : index
    %28 = vector.load %arg3[%c0_17, %c0_18] : memref<64x1xf32, #tpu.memory_space<vmem>>, vector<64x1xf32>
    %cst_19 = arith.constant dense<0.000000e+00> : vector<64xf32>
    %29 = vector.multi_reduction <add>, %24, %cst_19 [1] : vector<64x32xf32> to vector<64xf32>
    %30 = vector.shape_cast %29 : vector<64xf32> to vector<64x1xf32>
    %31 = arith.addf %28, %30 : vector<64x1xf32>
    %c0_20 = arith.constant 0 : index
    %c0_21 = arith.constant 0 : index
    %32 = vector.load %arg10[%c0_20, %c0_21] : memref<64x32xf32, #tpu.memory_space<vmem>>, vector<64x32xf32>
    tpu.vector_store %arg10[%c0_20, %c0_21], %27 {strides = array<i32>} : memref<64x32xf32, #tpu.memory_space<vmem>>, vector<64x32xf32>,
    %c0_22 = arith.constant 0 : index
    %c0_23 = arith.constant 0 : index
    %33 = vector.load %arg11[%c0_22, %c0_23] : memref<64x1xf32, #tpu.memory_space<vmem>>, vector<64x1xf32>
    tpu.vector_store %arg11[%c0_22, %c0_23], %31 {strides = array<i32>} : memref<64x1xf32, #tpu.memory_space<vmem>>, vector<64x1xf32>,
    return
  }
  func.func @transform_0(%arg0: i32) -> (i32, i32) {
    %c0_i32 = arith.constant 0 : i32
    %c0_i32_0 = arith.constant 0 : i32
    return %arg0, %c0_i32 : i32, i32
  }
  func.func @transform_1(%arg0: i32) -> (i32, i32) {
    %c0_i32 = arith.constant 0 : i32
    %c0_i32_0 = arith.constant 0 : i32
    return %arg0, %c0_i32 : i32, i32
  }
  func.func @transform_2(%arg0: i32) -> (i32, i32) {
    %c0_i32 = arith.constant 0 : i32
    %c0_i32_0 = arith.constant 0 : i32
    return %arg0, %c0_i32 : i32, i32
  }
  func.func @transform_3(%arg0: i32) -> (i32, i32) {
    %c0_i32 = arith.constant 0 : i32
    %c0_i32_0 = arith.constant 0 : i32
    %c0_i32_1 = arith.constant 0 : i32
    return %c0_i32, %c0_i32_0 : i32, i32
  }
  func.func @transform_4(%arg0: i32) -> (i32, i32) {
    %c0_i32 = arith.constant 0 : i32
    %c0_i32_0 = arith.constant 0 : i32
    %c0_i32_1 = arith.constant 0 : i32
    return %c0_i32, %c0_i32_0 : i32, i32
  }
  func.func @transform_5(%arg0: i32) -> (i32, i32) {
    %c0_i32 = arith.constant 0 : i32
    %c0_i32_0 = arith.constant 0 : i32
    %c0_i32_1 = arith.constant 0 : i32
    return %c0_i32, %c0_i32_0 : i32, i32
  }
  func.func @transform_6(%arg0: i32) -> (i32, i32) {
    %c0_i32 = arith.constant 0 : i32
    %c0_i32_0 = arith.constant 0 : i32
    %c0_i32_1 = arith.constant 0 : i32
    return %c0_i32, %c0_i32_0 : i32, i32
  }
  func.func @transform_7(%arg0: i32) -> (i32, i32) {
    %c0_i32 = arith.constant 0 : i32
    %c0_i32_0 = arith.constant 0 : i32
    %c0_i32_1 = arith.constant 0 : i32
    return %c0_i32, %c0_i32_0 : i32, i32
  }
  func.func @transform_8(%arg0: i32) -> (i32, i32) {
    %c0_i32 = arith.constant 0 : i32
    %c0_i32_0 = arith.constant 0 : i32
    %c0_i32_1 = arith.constant 0 : i32
    return %c0_i32, %c0_i32_0 : i32, i32
  }
  func.func @transform_9(%arg0: i32) -> (i32, i32) {
    %c0_i32 = arith.constant 0 : i32
    %c0_i32_0 = arith.constant 0 : i32
    return %arg0, %c0_i32 : i32, i32
  }
  func.func @transform_10(%arg0: i32) -> (i32, i32) {
    %c0_i32 = arith.constant 0 : i32
    %c0_i32_0 = arith.constant 0 : i32
    return %arg0, %c0_i32 : i32, i32
  }
}

</mosaic_0001>

<bundles_post_ra>
// kernel: tpu_custom_call.1
= control target key start
LH: loop header
LB: loop body
LE: loop exit
PB: predicated region body
PF: predicated region fallthrough
CT: control target
= control target key end

     0   :  { %s1290_s13 = smov 0   ;;  %s1489_s0 = inlined_call_operand.vmem [shape: f32[256,32], index: 0, kind: input, shape index: {}]   ;;  %s1490_s1 = inlined_call_operand.vmem [shape: f32[256,32], index: 1, kind: input, shape index: {}]   ;;  %s1491_s2 = inlined_call_operand.vmem [shape: f32[256,1], index: 2, kind: input, shape index: {}]   ;;  %s1492_s3 = inlined_call_operand.vmem [shape: bf16[32,256], index: 3, kind: input, shape index: {}]   ;;  %s1493_s4 = inlined_call_operand.vmem [shape: f32[1,256], index: 4, kind: input, shape index: {}]   ;;  %s1494_s5 = inlined_call_operand.vmem [shape: bf16[256,64], index: 5, kind: input, shape index: {}]   ;;  %s1495_s6 = inlined_call_operand.vmem [shape: f32[1,64], index: 6, kind: input, shape index: {}]   ;;  %s1496_s7 = inlined_call_operand.vmem [shape: f32[1,32], index: 7, kind: input, shape index: {}]   ;;  %s1497_s8 = inlined_call_operand.vmem [shape: f32[1,32], index: 8, kind: input, shape index: {}]   ;;  %s1498_s9 = inlined_call_operand.vmem [shape: f32[256,32], index: 9, kind: output, shape index: {0}]   ;;  %s1499_s10 = inlined_call_operand.vmem [shape: f32[256,1], index: 10, kind: output, shape index: {1}]  }
   0x1 LB: > { %s1061_s14 = sadd.s32 4294967295, %s1231_s13   ;;  %p1065_p0 = scmp.ge.s32.totalorder %s1231_s13, 1  ;;  %s1231_s13 = sphi %s1290_s13, %s21_s13  }
   0x2   : > { %p338_p1 = scmp.lt.s32.totalorder %s1231_s13, 5 }
   0x4   : > { %p339_p2 = pnand %p1065_p0, %p338_p1 }
   0x5   : > { %v1171_v0 = vld [vmem:[%s1492_s3 + $0x4] ss:$8 sps:$4 sm:$0xff] (!%p339_p2)   ;;  %s1066_s17 = sshll.u32 (!%p339_p2), %s1061_s14, 3  ;;  %v1173_v1 = vld [vmem:[%s1492_s3] ss:$8 sps:$4 sm:$0xff] (!%p339_p2)   ;;  %v1233_v2 = vmov (!%p339_p2), 0   ;;  %v448_v33 = vlaneseq (!%p339_p2) }
   0x6   : > { %342 = sbr.rel (%p339_p2) target bundleno = 701 (0x2bd), region = 56  ;;  %523 = vmatprep.mubr.bf16.mxu0 (!%p339_p2), %v1233_v2  ;;  %p392_p3 = scmp.lt.s32.totalorder (!%p339_p2), %s1066_s17, 31  ;;  %491 = vmatprep.subr.bf16.mxu0 (!%p339_p2), %v1171_v0  ;;  %v1174_v3 = vld [vmem:[%s1492_s3 + $0x14] ss:$8 sps:$4 sm:$0xff] (!%p339_p2)   ;;  %v1176_v4 = vld [vmem:[%s1492_s3 + $0x10] ss:$8 sps:$4 sm:$0xff] (!%p339_p2)  }
   0x7   : > { %492 = vmatpush1.bf16.msra.mxu0 (!%p339_p2), %v1173_v1  ;;  %v1177_v5 = vld [vmem:[%s1494_s5 + $0x40] sm:$0xff] (!%p339_p2)   ;;  %v1179_v7 = vld [vmem:[%s1494_s5 + $0x48] sm:$0xff] (!%p339_p2)   ;;  %vm478_vm0 = vcmask (!%p339_p2), 261120   ;;  %v1181_v13 = vld [vmem:[%s1494_s5 + $0x50] sm:$0xff] (!%p339_p2)   ;;  %v449_v34 = vshrl.u32 (!%p339_p2), %v448_v33, 7  ;;  %s1234_s27 = smov (!%p339_p2), 96  }
   0x8   : > { %493 = vmatprep.subr.bf16.mxu0 (!%p339_p2), %v1174_v3  ;;  %v1178_v6 = vld [vmem:[%s1494_s5] sm:$0xff] (!%p339_p2)   ;;  %1145 = vmatprep.subr.bf16.mxu1 (!%p339_p2), %v1177_v5  ;;  %v1180_v11 = vld [vmem:[%s1494_s5 + $0x8] sm:$0xff] (!%p339_p2)   ;;  %v1182_v15 = vld [vmem:[%s1494_s5 + $0x10] sm:$0xff] (!%p339_p2)   ;;  %vm938_vm1 = vcmask (!%p339_p2), 7168  }
   0x9   : > { %1153 = vmatpush3.bf16.msra.mxu1 (!%p339_p2), %v1178_v6  ;;  %v1183_v16 = vld [vmem:[%s1494_s5 + $0x58] sm:$0xff] (!%p339_p2)   ;;  %v1185_v21 = vld [vmem:[%s1494_s5 + $0x60] sm:$0xff] (!%p339_p2)   ;;  %v1187_v23 = vld [vmem:[%s1494_s5 + $0x68] sm:$0xff] (!%p339_p2)   ;;  %v450_v35 = vsub.s32 (!%p339_p2), 0, %v449_v34  ;;  %v454_v37 = vsub.s32 (!%p339_p2), 1, %v449_v34 }
   0xa   : > { %1146 = vmatprep.subr.bf16.mxu1 (!%p339_p2), %v1179_v7  ;;  %v1184_v18 = vld [vmem:[%s1494_s5 + $0x18] sm:$0xff] (!%p339_p2)   ;;  %v1186_v22 = vld [vmem:[%s1494_s5 + $0x20] sm:$0xff] (!%p339_p2)   ;;  %v1188_v25 = vld [vmem:[%s1494_s5 + $0x28] sm:$0xff] (!%p339_p2)  }
   0xb   : > { %494 = vmatpush1.bf16.msra.mxu0 (!%p339_p2), %v1176_v4  ;;  %v1189_v29 = vld [vmem:[%s1494_s5 + $0x70] sm:$0xff] (!%p339_p2)   ;;  %v1191_v31 = vld [vmem:[%s1494_s5 + $0x78] sm:$0xff] (!%p339_p2)   ;;  %v446_v36 = vld [vmem:[%s1493_s4] sm:$0x3] (!%p339_p2) }
   0xc   : > { %1105 = vmatprep.subr.bf16.mxu0 (!%p339_p2), %v1177_v5  ;;  %v1190_v30 = vld [vmem:[%s1494_s5 + $0x30] sm:$0xff] (!%p339_p2)   ;;  %v1192_v32 = vld [vmem:[%s1494_s5 + $0x38] sm:$0xff] (!%p339_p2)   ;;  %v451_v38 = vrot.slane (!%p339_p2), %v446_v36, %v450_v35  ;;  %v455_v39 = vrot.slane (!%p339_p2), %v446_v36, %v454_v37  ;;  %v1084_v34 = vld [vmem:[%s1495_s6] ss:$0 sm:$0xff] (!%p339_p2) }
   0xd   : > { %s1501_s17 = smov (!%p392_p3, %s1066_s17), 31  ;;  %1154 = vmatpush3.bf16.msra.mxu1 %v1180_v11 }
   0xe   : > { %s1316_s28 = sshll.u32 %s1501_s17, 3  ;;  %1147 = vmatprep.subr.bf16.mxu1 %v1181_v13 }
   0xf   : > { %s1325_s14 = scalar_lea.vmem %s1490_s1, %s1316_s28  ;;  %s1415_s17 = scalar_lea.vmem %s1489_s0, %s1316_s28 }
  0x10   : > { %v422_v8 = vld [vmem:[%s1325_s14] sm:$0xff]  ;;  %v423_v9 = vld [vmem:[%s1325_s14 + $0x8] sm:$0xff]  ;;  %v424_v12 = vld [vmem:[%s1325_s14 + $0x10] sm:$0xff]  ;;  %s1424_s20 = scalar_lea.vmem %s1498_s9, %s1316_s28  ;;  %s1443_s22 = scalar_lea.vmem %s1491_s2, %s1316_s28 }
  0x11   : > { %v438_v10 = vpack.c.bf16 %v423_v9, %v422_v8  ;;  %v425_v14 = vld [vmem:[%s1325_s14 + $0x18] sm:$0xff]  ;;  %1155 = vmatpush3.bf16.msra.mxu1 %v1182_v15  ;;  %v426_v19 = vld [vmem:[%s1325_s14 + $0x20] sm:$0xff]  ;;  %v427_v20 = vld [vmem:[%s1325_s14 + $0x28] sm:$0xff]  ;;  %s1450_s25 = scalar_lea.vmem %s1499_s10, %s1316_s28 }
  0x12   : > { %v439_v17 = vpack.c.bf16 %v425_v14, %v424_v12  ;;  %1148 = vmatprep.subr.bf16.mxu1 %v1183_v16  ;;  %v440_v24 = vpack.c.bf16 %v427_v20, %v426_v19  ;;  %v428_v26 = vld [vmem:[%s1325_s14 + $0x30] sm:$0xff]  ;;  %v429_v27 = vld [vmem:[%s1325_s14 + $0x38] sm:$0xff] }
  0x13   : > { %1080 = vmatmul.mubr.msk.bf16.vlgmr.msra.gmra.mrb[0].mxu0 %vm478_vm0, %v438_v10  ;;  %v441_v28 = vpack.c.bf16 %v429_v27, %v428_v26 }
  0x14   : > { %533 = vmatprep.mubr.bf16.mxu0 %v1233_v2  ;;  %1106 = vmatpush3.bf16.msra.mxu0 %v1178_v6 }
  0x15   : > { %1107 = vmatprep.subr.bf16.mxu0 %v1179_v7  ;;  %1156 = vmatpush3.bf16.msra.mxu1 %v1184_v18 }
  0x16   : > { %1149 = vmatprep.subr.bf16.mxu1 %v1185_v21 }
  0x18   : > { %1108 = vmatpush3.bf16.msra.mxu0 %v1180_v11 }
  0x19   : > { %1109 = vmatprep.subr.bf16.mxu0 %v1181_v13  ;;  %1157 = vmatpush3.bf16.msra.mxu1 %v1186_v22 }
  0x1a   : > { %1150 = vmatprep.subr.bf16.mxu1 %v1187_v23 }
  0x1b   : > { %1081 = vmatmul.mubr.msk.bf16.gmra.mrb[4].mxu0 %vm478_vm0, %v439_v17 }
  0x1c   : > { %543 = vmatprep.mubr.bf16.mxu0 %v1233_v2  ;;  %1110 = vmatpush3.bf16.msra.mxu0 %v1182_v15 }
  0x1d   : > { %1111 = vmatprep.subr.bf16.mxu0 %v1183_v16  ;;  %1158 = vmatpush3.bf16.msra.mxu1 %v1188_v25 }
  0x1e   : > { %1151 = vmatprep.subr.bf16.mxu1 %v1189_v29 }
  0x20   : > { %1112 = vmatpush3.bf16.msra.mxu0 %v1184_v18 }
  0x21   : > { %1113 = vmatprep.subr.bf16.mxu0 %v1185_v21  ;;  %1159 = vmatpush3.bf16.msra.mxu1 %v1190_v30 }
  0x22   : > { %1152 = vmatprep.subr.bf16.mxu1 %v1191_v31 }
  0x23   : > { %1082 = vmatmul.mubr.msk.bf16.gmra.mrb[8].mxu0 %vm478_vm0, %v440_v24 }
  0x24   : > { %553 = vmatprep.mubr.bf16.mxu0 %v1233_v2  ;;  %1114 = vmatpush3.bf16.msra.mxu0 %v1186_v22 }
  0x25   : > { %1115 = vmatprep.subr.bf16.mxu0 %v1187_v23  ;;  %1160 = vmatpush3.bf16.msra.mxu1 %v1192_v32 }
  0x28   : > { %1116 = vmatpush3.bf16.msra.mxu0 %v1188_v25 }
  0x29   : > { %1117 = vmatprep.subr.bf16.mxu0 %v1189_v29 }
  0x2b   : > { %1083 = vmatmul.mubr.msk.bf16.gmra.mrb[12].mxu0 %vm478_vm0, %v441_v28 }
  0x2c   : > { %1118 = vmatpush3.bf16.msra.mxu0 %v1190_v30 }
  0x2d   : > { %1119 = vmatprep.subr.bf16.mxu0 %v1191_v31 }
  0x30   : > { %1120 = vmatpush3.bf16.msra.mxu0 %v1192_v32 }
  0xe6   : > { %v525_v40 = vpop.f32.mrb[0].mxu0 }
  0xe7   : > { %v526_v41 = vadd.f32 %v525_v40, %v451_v38  ;;  %v527_v42 = vpop.f32.mrb[1].mxu0 }
  0xe8   : > { %v528_v43 = vadd.f32 %v527_v42, %v455_v39  ;;  %v529_v44 = vpop.f32.mrb[2].mxu0 }
  0xe9   : > { %v530_v45 = vadd.f32 %v529_v44, %v451_v38  ;;  %v531_v46 = vpop.f32.mrb[3].mxu0  ;;  %v564_v48 = vmax.f32 %v526_v41, 0.0 }
  0xea   : > { %v532_v47 = vadd.f32 %v531_v46, %v455_v39  ;;  %v565_v50 = vmax.f32 %v528_v43, 0.0  ;;  %v1101_v46 = vld [vmem:[%s1497_s8] ss:$0 sm:$0xff] }
  0xeb   : > { %v566_v49 = vmax.f32 %v530_v45, 0.0 }
  0xec   : > { %v567_v51 = vmax.f32 %v532_v47, 0.0 }
  0xed   : > { %v580_v52 = vpack.c.bf16 %v566_v49, %v564_v48 }
  0xee   : > { %v581_v53 = vpack.c.bf16 %v567_v51, %v565_v50  ;;  %v535_v54 = vpop.f32.mrb[4].mxu0 }
  0xef   : > { %v536_v55 = vadd.f32 %v535_v54, %v451_v38  ;;  %v537_v56 = vpop.f32.mrb[5].mxu0 }
  0xf0   : > { %v538_v57 = vadd.f32 %v537_v56, %v455_v39  ;;  %v539_v58 = vpop.f32.mrb[6].mxu0  ;;  %755 = vmatprep.mubr.bf16.mxu0 %v581_v53 }
  0xf1   : > { %v568_v59 = vmax.f32 %v536_v55, 0.0  ;;  %v540_v60 = vadd.f32 %v539_v58, %v451_v38  ;;  %v541_v61 = vpop.f32.mrb[7].mxu0  ;;  %756 = vmatmul.mubr.bf16.vlgmr.msra.gmra.mrb[16].mxu0 %v580_v52 }
  0xf2   : > { %v569_v62 = vmax.f32 %v538_v57, 0.0  ;;  %v542_v63 = vadd.f32 %v541_v61, %v455_v39 }
  0xf3   : > { %v570_v0 = vmax.f32 %v540_v60, 0.0 }
  0xf4   : > { %v571_v1 = vmax.f32 %v542_v63, 0.0 }
  0xf5   : > { %v582_v2 = vpack.c.bf16 %v570_v0, %v568_v59 }
  0xf6   : > { %v545_v3 = vpop.f32.mrb[8].mxu0  ;;  %v583_v4 = vpack.c.bf16 %v571_v1, %v569_v62 }
  0xf7   : > { %v546_v5 = vadd.f32 %v545_v3, %v451_v38  ;;  %v547_v6 = vpop.f32.mrb[9].mxu0 }
  0xf8   : > { %v548_v7 = vadd.f32 %v547_v6, %v455_v39  ;;  %v549_v8 = vpop.f32.mrb[10].mxu0  ;;  %763 = vmatprep.mubr.bf16.mxu1 %v583_v4 }
  0xf9   : > { %v572_v9 = vmax.f32 %v546_v5, 0.0  ;;  %v550_v10 = vadd.f32 %v549_v8, %v451_v38  ;;  %v551_v11 = vpop.f32.mrb[11].mxu0  ;;  %764 = vmatmul.mubr.bf16.vlgmr.msra.gmra.mrb[0].mxu1 %v582_v2  ;;  %v1102_v2 = vld [vmem:[%s1496_s7] ss:$0 sm:$0xff] }
  0xfa   : > { %v573_v12 = vmax.f32 %v548_v7, 0.0  ;;  %v552_v13 = vadd.f32 %v551_v11, %v455_v39 }
  0xfb   : > { %v574_v14 = vmax.f32 %v550_v10, 0.0 }
  0xfc   : > { %v575_v15 = vmax.f32 %v552_v13, 0.0 }
  0xfd   : > { %v584_v16 = vpack.c.bf16 %v574_v14, %v572_v9 }
  0xfe   : > { %v585_v17 = vpack.c.bf16 %v575_v15, %v573_v12  ;;  %v555_v18 = vpop.f32.mrb[12].mxu0 }
  0xff   : > { %v556_v19 = vadd.f32 %v555_v18, %v451_v38  ;;  %v557_v20 = vpop.f32.mrb[13].mxu0 }
 0x100   : > { %771 = vmatprep.mubr.bf16.mxu1 %v585_v17  ;;  %v558_v21 = vadd.f32 %v557_v20, %v455_v39  ;;  %v559_v22 = vpop.f32.mrb[14].mxu0 }
 0x101   : > { %772 = vmatmul.mubr.bf16.gmra.mrb[4].mxu1 %v584_v16  ;;  %v576_v23 = vmax.f32 %v556_v19, 0.0  ;;  %v560_v24 = vadd.f32 %v559_v22, %v451_v38  ;;  %v561_v25 = vpop.f32.mrb[15].mxu0 }
 0x102   : > { %v577_v26 = vmax.f32 %v558_v21, 0.0  ;;  %v562_v27 = vadd.f32 %v561_v25, %v455_v39 }
 0x103   : > { %v578_v28 = vmax.f32 %v560_v24, 0.0 }
 0x104   : > { %v579_v29 = vmax.f32 %v562_v27, 0.0 }
 0x105   : > { %v586_v30 = vpack.c.bf16 %v578_v28, %v576_v23 }
 0x106   : > { %v587_v31 = vpack.c.bf16 %v579_v29, %v577_v26 }
 0x108   : > { %779 = vmatprep.mubr.bf16.mxu1 %v587_v31 }
 0x109   : > { %780 = vmatmul.mubr.bf16.gmra.mrb[8].mxu1 %v586_v30 }
 0x1c4   : > { %v1121_v32 = vpop.f32.mrb[16].mxu0 }
 0x1c5   : > { %v1122_v33 = vpop.f32.mrb[17].mxu0 }
 0x1c6   : > { %v1123_v35 = vadd.f32 %v1122_v33, %v1121_v32  ;;  %v1124_v36 = vpop.f32.mrb[18].mxu0 }
 0x1c7   : > { %v1125_v37 = vpop.f32.mrb[19].mxu0 }
 0x1c8   : > { %v1126_v40 = vadd.f32 %v1125_v37, %v1124_v36  ;;  %v758_v38 = vadd.f32 %v1123_v35, %v1084_v34 }
 0x1ca   : > { %834 = vrot.lane.b32.xlu0 %v758_v38, %s1234_s27  ;;  %v761_v39 = vadd.f32 %v1126_v40, %v1084_v34  ;;  %v795_v50 = vmul.f32 %v1101_v46, %v758_v38  ;;  %v430_v40 = vld [vmem:[%s1415_s17] sm:$0xff] }
 0x1cc   : > { %v1127_v41 = vpop.f32.mrb[0].mxu1  ;;  %836 = vrot.lane.b32.xlu1 %v761_v39, %s1234_s27  ;;  %1193 = vtanh.f32 %v795_v50  ;;  %v796_v22 = vmul.f32 %v1101_v46, %v761_v39  ;;  %v432_v50 = vld [vmem:[%s1415_s17 + $0x10] sm:$0xff] }
 0x1cd   : > { %v1128_v42 = vpop.f32.mrb[1].mxu1 }
 0x1ce   : > { %v1129_v43 = vadd.f32 %v1128_v42, %v1127_v41  ;;  %v1130_v44 = vpop.f32.mrb[2].mxu1  ;;  %v431_v41 = vld [vmem:[%s1415_s17 + $0x8] sm:$0xff] }
 0x1cf   : > { %v1131_v45 = vpop.f32.mrb[3].mxu1 }
 0x1d0   : > { %v766_v47 = vadd.f32 %v1129_v43, %v1084_v34  ;;  %v1132_v48 = vadd.f32 %v1131_v45, %v1130_v44 }
 0x1d2   : > { %v769_v49 = vadd.f32 %v1132_v48, %v1084_v34  ;;  %838 = vrot.lane.b32.xlu1 %v766_v47, %s1234_s27  ;;  %v797_v5 = vmul.f32 %v1101_v46, %v766_v47 }
 0x1d4   : > { %v1133_v51 = vpop.f32.mrb[4].mxu1  ;;  %1195 = vtanh.f32 %v797_v5  ;;  %v798_v6 = vmul.f32 %v1101_v46, %v769_v49  ;;  %v434_v5 = vld [vmem:[%s1415_s17 + $0x20] sm:$0xff] }
 0x1d5   : > { %v1134_v52 = vpop.f32.mrb[5].mxu1 }
 0x1d6   : > { %v1135_v53 = vadd.f32 %v1134_v52, %v1133_v51  ;;  %v1136_v54 = vpop.f32.mrb[6].mxu1  ;;  %840 = vrot.lane.b32.xlu1 %v769_v49, %s1234_s27  ;;  %v1194_v1 = vpop.eup %1193  ;;  %1197 = vtanh.f32 %v798_v6 }
 0x1d7   : > { %v1137_v55 = vpop.f32.mrb[7].mxu1  ;;  %v818_v3 = vmul.f32 %v1194_v1, %v1102_v2 }
 0x1d8   : > { %v1138_v56 = vadd.f32 %v1137_v55, %v1136_v54  ;;  %v774_v13 = vadd.f32 %v1135_v53, %v1084_v34  ;;  %v433_v54 = vld [vmem:[%s1415_s17 + $0x18] sm:$0xff] }
 0x1d9   : > { %v898_v4 = vsel %vm478_vm0, %v818_v3, 0.0  ;;  %v866_v35 = vmul.f32 1.442695, %v818_v3 }
 0x1da   : > { %v777_v57 = vadd.f32 %v1138_v56, %v1084_v34  ;;  %v799_v24 = vmul.f32 %v1101_v46, %v774_v13 }
 0x1dc   : > { %844 = vrot.lane.b32.xlu1 %v777_v57, %s1234_s27  ;;  %v1139_v58 = vpop.f32.mrb[8].mxu1  ;;  %v800_v8 = vmul.f32 %v1101_v46, %v777_v57 }
 0x1dd   : > { %v1140_v59 = vpop.f32.mrb[9].mxu1 }
 0x1de   : > { %v1141_v60 = vadd.f32 %v1140_v59, %v1139_v58  ;;  %v1142_v61 = vpop.f32.mrb[10].mxu1  ;;  %1199 = vtanh.f32 %v800_v8  ;;  %v1196_v10 = vpop.eup %1195 }
 0x1df   : > { %v1143_v62 = vpop.f32.mrb[11].mxu1  ;;  %v820_v11 = vmul.f32 %v1196_v10, %v1102_v2  ;;  %v892_v10 = vld [vmem:[%s1443_s22 + $0x10] sm:$0xff] }
 0x1e0   : > { %v782_v63 = vadd.f32 %v1141_v60, %v1084_v34  ;;  %v1144_v0 = vadd.f32 %v1143_v62, %v1142_v61  ;;  %v1198_v12 = vpop.eup %1197  ;;  %v435_v60 = vld [vmem:[%s1415_s17 + $0x28] sm:$0xff] }
 0x1e1   : > { %v904_v14 = vsel %vm478_vm0, %v820_v11, 0.0  ;;  %v821_v15 = vmul.f32 %v1198_v12, %v1102_v2  ;;  %v870_v37 = vmul.f32 1.442695, %v820_v11 }
 0x1e2   : > { %v785_v7 = vadd.f32 %v1144_v0, %v1084_v34  ;;  %v801_v25 = vmul.f32 %v1101_v46, %v782_v63 }
 0x1e3   : > { %v907_v18 = vsel %vm478_vm0, %v821_v15, 0.0  ;;  %v872_v38 = vmul.f32 1.442695, %v821_v15 }
 0x1e4   : > { %v802_v9 = vmul.f32 %v1101_v46, %v785_v7 }
 0x1e6   : > { %1201 = vtanh.f32 %v802_v9 }
 0x1e7   : > { %1203 = vtanh.f32 %v796_v22 }
 0x1e8   : > { %v1200_v16 = vpop.eup %1199  ;;  %1205 = vtanh.f32 %v799_v24  ;;  %v437_v24 = vld [vmem:[%s1415_s17 + $0x38] sm:$0xff] }
 0x1e9   : > { %899 = vadd.xlane.f32.xlu0 %v898_v4  ;;  %v823_v19 = vmul.f32 %v1200_v16, %v1102_v2  ;;  %1207 = vtanh.f32 %v801_v25 }
 0x1ea   : > { %1209 = vpow2.f32 %v866_v35 }
 0x1eb   : > { %v913_v21 = vsel %vm478_vm0, %v823_v19, 0.0  ;;  %v876_v49 = vmul.f32 1.442695, %v823_v19 }
 0x1f0   : > { %v1202_v17 = vpop.eup %1201 }
 0x1f1   : > { %v1399_v20 = vmul.f32 %v1202_v17, %v1102_v2  ;;  %v1204_v26 = vpop.eup %1203  ;;  %v895_v17 = vld [vmem:[%s1443_s22 + $0x28] sm:$0xff] }
 0x1f2   : > { %v819_v27 = vmul.f32 %v1204_v26, %v1102_v2  ;;  %v1206_v28 = vpop.eup %1205 }
 0x1f3   : > { %v919_v23 = vsel %vm478_vm0, %v1399_v20, 0.0  ;;  %v822_v30 = vmul.f32 %v1206_v28, %v1102_v2  ;;  %v1208_v31 = vpop.eup %1207  ;;  %v891_v28 = vld [vmem:[%s1443_s22 + $0x8] sm:$0xff] }
 0x1f4   : > { %v901_v29 = vsel %vm478_vm0, %v819_v27, 0.0  ;;  %v1407_v33 = vmul.f32 %v1208_v31, %v1102_v2  ;;  %v868_v36 = vmul.f32 1.442695, %v819_v27  ;;  %v1210_v43 = vpop.eup %1209  ;;  %v890_v2 = vld [vmem:[%s1443_s22] sm:$0xff] }
 0x1f5   : > { %v910_v32 = vsel %vm478_vm0, %v822_v30, 0.0  ;;  %v874_v1 = vmul.f32 1.442695, %v822_v30 }
 0x1f6   : > { %v916_v34 = vsel %vm478_vm0, %v1407_v33, 0.0  ;;  %1211 = vpow2.f32 %v868_v36  ;;  %v896_v36 = vld [vmem:[%s1443_s22 + $0x30] sm:$0xff] }
 0x1f7   : > { %1213 = vpow2.f32 %v870_v37 }
 0x1f8   : > { %1215 = vpow2.f32 %v872_v38  ;;  %v436_v38 = vld [vmem:[%s1415_s17 + $0x30] sm:$0xff] }
 0x1f9   : > { %1217 = vpow2.f32 %v876_v49 }
 0x1fa   : > { %1219 = vpow2.f32 %v874_v1 }
 0x1ff   : > { %842 = vrot.lane.b32.xlu0 %v774_v13, %s1234_s27  ;;  %v893_v13 = vld [vmem:[%s1443_s22 + $0x18] sm:$0xff] }
 0x200   : > { %905 = vadd.xlane.f32.xlu1 %v904_v14  ;;  %v1212_v47 = vpop.eup %1211  ;;  %v880_v14 = vmul.f32 1.442695, %v1399_v20 }
 0x201   : > { %v1214_v53 = vpop.eup %1213 }
 0x202   : > { %v1216_v58 = vpop.eup %1215  ;;  %1221 = vpow2.f32 %v880_v14 }
 0x204   : > { %908 = vadd.xlane.f32.xlu1 %v907_v18 }
 0x208   : > { %914 = vadd.xlane.f32.xlu1 %v913_v21  ;;  %v897_v21 = vld [vmem:[%s1443_s22 + $0x38] sm:$0xff] }
 0x20c   : > { %920 = vadd.xlane.f32.xlu1 %v919_v23 }
 0x21d   : > { %848 = vrot.lane.b32.xlu1 %v785_v7, %s1234_s27 }
 0x21e   : > { %902 = vadd.xlane.f32.xlu0 %v901_v29  ;;  %v878_v29 = vmul.f32 1.442695, %v1407_v33 }
 0x220   : > { %1223 = vpow2.f32 %v878_v29 }
 0x222   : > { %911 = vadd.xlane.f32.xlu0 %v910_v32  ;;  %v894_v32 = vld [vmem:[%s1443_s22 + $0x20] sm:$0xff] }
 0x226   : > { %917 = vadd.xlane.f32.xlu0 %v916_v34 }
 0x23c   : > { %v835_v39 = vpop.permute.xlu0 %834  ;;  %846 = vrot.lane.b32.xlu0 %v782_v63, %s1234_s27  ;;  %v1218_v63 = vpop.eup %1217 }
 0x23d   : > { %v858_v42 = vadd.f32 %v835_v39, %v430_v40  ;;  %v1220_v8 = vpop.eup %1219 }
 0x23e   : > { %v837_v44 = vpop.permute.xlu1 %836  ;;  %v1222_v26 = vpop.eup %1221 }
 0x23f   : > { %v882_v45 = vmul.f32 %v1210_v43, %v858_v42  ;;  %v859_v46 = vadd.f32 %v837_v44, %v431_v41  ;;  %v1224_v33 = vpop.eup %1223 }
 0x241   : > { %930 = vst.msk [vmem:[%s1424_s20] sm:$0xff] %vm478_vm0, %v882_v45  ;;  %v883_v48 = vmul.f32 %v1212_v47, %v859_v46 }
 0x243   : > { %931 = vst.msk [vmem:[%s1424_s20 + $0x8] sm:$0xff] %vm478_vm0, %v883_v48 }
 0x244   : > { %v839_v51 = vpop.permute.xlu1 %838 }
 0x245   : > { %v860_v52 = vadd.f32 %v839_v51, %v432_v50 }
 0x247   : > { %v884_v55 = vmul.f32 %v1214_v53, %v860_v52 }
 0x248   : > { %v841_v56 = vpop.permute.xlu1 %840 }
 0x249   : > { %932 = vst.msk [vmem:[%s1424_s20 + $0x10] sm:$0xff] %vm478_vm0, %v884_v55  ;;  %v861_v57 = vadd.f32 %v841_v56, %v433_v54 }
 0x24b   : > { %v885_v59 = vmul.f32 %v1216_v58, %v861_v57 }
 0x24d   : > { %933 = vst.msk [vmem:[%s1424_s20 + $0x18] sm:$0xff] %vm478_vm0, %v885_v59 }
 0x24e   : > { %v845_v61 = vpop.permute.xlu1 %844 }
 0x24f   : > { %v863_v62 = vadd.f32 %v845_v61, %v435_v60 }
 0x251   : > { %v887_v0 = vmul.f32 %v1218_v63, %v863_v62 }
 0x253   : > { %935 = vst.msk [vmem:[%s1424_s20 + $0x28] sm:$0xff] %vm478_vm0, %v887_v0 }
 0x276   : > { %v900_v3 = vpop.xlane.xlu0 %899 }
 0x277   : > { %v922_v4 = vadd.f32 %v900_v3, %v890_v2 }
 0x279   : > { %939 = vst.msk [vmem:[%s1450_s25] sm:$0xff] %vm938_vm1, %v922_v4 }
 0x27a   : > { %v843_v6 = vpop.permute.xlu0 %842 }
 0x27b   : > { %v862_v7 = vadd.f32 %v843_v6, %v434_v5 }
 0x27d   : > { %v886_v9 = vmul.f32 %v1220_v8, %v862_v7 }
 0x27f   : > { %934 = vst.msk [vmem:[%s1424_s20 + $0x20] sm:$0xff] %vm478_vm0, %v886_v9 }
 0x28d   : > { %v906_v11 = vpop.xlane.xlu1 %905 }
 0x28e   : > { %v924_v12 = vadd.f32 %v906_v11, %v892_v10 }
 0x290   : > { %941 = vst.msk [vmem:[%s1450_s25 + $0x10] sm:$0xff] %vm938_vm1, %v924_v12 }
 0x291   : > { %v909_v15 = vpop.xlane.xlu1 %908 }
 0x292   : > { %v925_v16 = vadd.f32 %v909_v15, %v893_v13 }
 0x294   : > { %942 = vst.msk [vmem:[%s1450_s25 + $0x18] sm:$0xff] %vm938_vm1, %v925_v16 }
 0x295   : > { %v915_v18 = vpop.xlane.xlu1 %914 }
 0x296   : > { %v927_v19 = vadd.f32 %v915_v18, %v895_v17 }
 0x298   : > { %944 = vst.msk [vmem:[%s1450_s25 + $0x28] sm:$0xff] %vm938_vm1, %v927_v19 }
 0x299   : > { %v921_v22 = vpop.xlane.xlu1 %920 }
 0x29a   : > { %v929_v23 = vadd.f32 %v921_v22, %v897_v21 }
 0x29c   : > { %946 = vst.msk [vmem:[%s1450_s25 + $0x38] sm:$0xff] %vm938_vm1, %v929_v23 }
 0x29d   : > { %v849_v20 = vpop.permute.xlu1 %848 }
 0x29e   : > { %v865_v25 = vadd.f32 %v849_v20, %v437_v24 }
 0x2a0   : > { %v889_v27 = vmul.f32 %v1222_v26, %v865_v25 }
 0x2a2   : > { %937 = vst.msk [vmem:[%s1424_s20 + $0x38] sm:$0xff] %vm478_vm0, %v889_v27 }
 0x2ab   : > { %v903_v30 = vpop.xlane.xlu0 %902 }
 0x2ac   : > { %v923_v31 = vadd.f32 %v903_v30, %v891_v28 }
 0x2ae   : > { %940 = vst.msk [vmem:[%s1450_s25 + $0x8] sm:$0xff] %vm938_vm1, %v923_v31 }
 0x2af   : > { %v912_v34 = vpop.xlane.xlu0 %911 }
 0x2b0   : > { %v926_v35 = vadd.f32 %v912_v34, %v894_v32 }
 0x2b2   : > { %943 = vst.msk [vmem:[%s1450_s25 + $0x20] sm:$0xff] %vm938_vm1, %v926_v35 }
 0x2b3   : > { %v918_v37 = vpop.xlane.xlu0 %917 }
 0x2b4   : > { %v928_v40 = vadd.f32 %v918_v37, %v896_v36 }
 0x2b6   : > { %945 = vst.msk [vmem:[%s1450_s25 + $0x30] sm:$0xff] %vm938_vm1, %v928_v40 }
 0x2b7   : > { %v847_v39 = vpop.permute.xlu0 %846 }
 0x2b8   : > { %v864_v41 = vadd.f32 %v847_v39, %v436_v38 }
 0x2ba   : > { %v888_v42 = vmul.f32 %v1224_v33, %v864_v41 }
 0x2bc   : > { %936 = vst.msk [vmem:[%s1424_s20 + $0x30] sm:$0xff] %vm478_vm0, %v888_v42 }
 0x2bd PF: > { %s21_s13 = sadd.s32 1, %s1231_s13  }
 0x2be   : > { %p18_p4 = scmp.ge.s32.totalorder %s21_s13, 6  }
 0x2c0   :  { %20 = sbr.rel (!%p18_p4) target bundleno = 1 (0x1), region = 104 }

</bundles_post_ra>
